<compile_context>
chip_gen: v7x
topology: tpu7x:2x2x1
jax: 0.10.0
libtpu: 0.0.40
codegen_flags: <defaults>
</compile_context>

<pallas_src>
import functools

import jax
import jax.numpy as jnp
from jax.experimental import pallas as pl
from jax.experimental.pallas import tpu as pltpu

EPS = 1e-5


def _multibnneck_kernel(x_ref, gamma_ref, beta_ref, mgamma_ref, mbeta_ref,
                        *out_refs, num_necks):
    if num_necks >= 2:
        yrest_ref, ysum_ref, merged_ref = out_refs
    else:
        ysum_ref, merged_ref = out_refs
        yrest_ref = None

    x = x_ref[...].astype(jnp.float32)                      # (N, TC)
    n = x.shape[0]
    inv_n = 1.0 / float(n)

    # Shared batch statistics (training-mode BatchNorm1d, biased variance).
    # Two-pass form for stability, but x - mean is computed once and reused.
    mean = jnp.sum(x, axis=0, keepdims=True) * inv_n        # (1, TC)
    xc = x - mean
    var = jnp.sum(xc * xc, axis=0, keepdims=True) * inv_n   # (1, TC)
    xhat = xc * jax.lax.rsqrt(var + EPS)                    # (N, TC)

    gamma = gamma_ref[...].astype(jnp.float32)              # (K, TC)
    beta = beta_ref[...].astype(jnp.float32)                # (K, TC)

    # Per-neck outputs for necks 1..K-1 only; neck 0's dict slot is aliased to
    # the running sum in the wrapper, so its slab is never written to HBM.
    for kk in range(1, num_necks):
        yk = xhat * gamma[kk:kk + 1, :] + beta[kk:kk + 1, :]
        yrest_ref[kk - 1, :, :] = yk.astype(yrest_ref.dtype)

    # Sum over necks (what outputs[loss_names[0]] aliases to), computed
    # analytically without materializing a (K, N, TC) stack.
    gsum = jnp.sum(gamma, axis=0, keepdims=True)            # (1, TC)
    bsum = jnp.sum(beta, axis=0, keepdims=True)             # (1, TC)
    ysum = xhat * gsum + bsum                               # (N, TC)
    ysum_ref[...] = ysum.astype(ysum_ref.dtype)

    # merged = mean over necks, then merge_neck BatchNorm1d (batch stats).
    merged = ysum * (1.0 / float(num_necks))
    m_mean = jnp.sum(merged, axis=0, keepdims=True) * inv_n
    mc = merged - m_mean
    m_var = jnp.sum(mc * mc, axis=0, keepdims=True) * inv_n
    m_hat = mc * jax.lax.rsqrt(m_var + EPS)
    merged_ref[...] = (m_hat * mgamma_ref[...].astype(jnp.float32)
                       + mbeta_ref[...].astype(jnp.float32)
                       ).astype(merged_ref.dtype)


def multi_bn_neck(x, gammas, betas, merge_gamma, merge_beta, loss_names,
                  *, block_c=512):
    """x: (N, C); gammas/betas: (K, C); merge_gamma/merge_beta: (1, C)."""
    n, c = x.shape
    k = len(loss_names)
    assert k >= 1
    assert gammas.shape == (k, c) and betas.shape == (k, c)
    assert merge_gamma.shape == (1, c) and merge_beta.shape == (1, c)
    out_dtype = x.dtype

    # Lane-align channels to a multiple of 128 and pick a channel tile that
    # is a multiple of 128 and divides the padded channel count.
    c128 = pl.cdiv(c, 128) * 128
    tc = max(128, min((block_c // 128) * 128, c128))
    while c128 % tc != 0:
        tc -= 128
    grid = (c128 // tc,)

    if c128 != c:
        pad = ((0, 0), (0, c128 - c))
        x_p = jnp.pad(x, pad)
        gammas_p = jnp.pad(gammas, pad)
        betas_p = jnp.pad(betas, pad)
        mgamma_p = jnp.pad(merge_gamma, pad)
        mbeta_p = jnp.pad(merge_beta, pad)
    else:
        x_p, gammas_p, betas_p = x, gammas, betas
        mgamma_p, mbeta_p = merge_gamma, merge_beta

    in_specs = [
        pl.BlockSpec((n, tc), lambda j: (0, j)),   # x
        pl.BlockSpec((k, tc), lambda j: (0, j)),   # gammas
        pl.BlockSpec((k, tc), lambda j: (0, j)),   # betas
        pl.BlockSpec((1, tc), lambda j: (0, j)),   # merge_gamma
        pl.BlockSpec((1, tc), lambda j: (0, j)),   # merge_beta
    ]

    if k >= 2:
        out_shape = (
            jax.ShapeDtypeStruct((k - 1, n, c128), out_dtype),  # necks 1..K-1
            jax.ShapeDtypeStruct((n, c128), out_dtype),         # sum over necks
            jax.ShapeDtypeStruct((n, c128), out_dtype),         # merge_neck out
        )
        out_specs = (
            pl.BlockSpec((k - 1, n, tc), lambda j: (0, 0, j)),
            pl.BlockSpec((n, tc), lambda j: (0, j)),
            pl.BlockSpec((n, tc), lambda j: (0, j)),
        )
    else:
        out_shape = (
            jax.ShapeDtypeStruct((n, c128), out_dtype),
            jax.ShapeDtypeStruct((n, c128), out_dtype),
        )
        out_specs = (
            pl.BlockSpec((n, tc), lambda j: (0, j)),
            pl.BlockSpec((n, tc), lambda j: (0, j)),
        )

    kernel = functools.partial(_multibnneck_kernel, num_necks=k)
    results = pl.pallas_call(
        kernel,
        out_shape=out_shape,
        grid=grid,
        in_specs=in_specs,
        out_specs=out_specs,
        compiler_params=pltpu.CompilerParams(
            dimension_semantics=("parallel",)),
    )(x_p, gammas_p, betas_p, mgamma_p, mbeta_p)

    if k >= 2:
        y_rest, y_sum, merged = results
    else:
        y_sum, merged = results
        y_rest = None

    outputs = {}
    # Faithful reproduction of the in-place `merged += outputs[name]` aliasing:
    # the first neck's dict entry is the running sum tensor.
    outputs[loss_names[0]] = y_sum[:, :c]
    for i in range(1, k):
        outputs[loss_names[i]] = y_rest[i - 1, :, :c]
    outputs['merged'] = merged[:, :c]
    return outputs


if __name__ == "__main__":
    key = jax.random.PRNGKey(0)
    batch, in_channels = 8, 32
    loss_names = ["softmax", "triplet", "center"]
    k = len(loss_names)

    x = jax.random.normal(key, (batch, in_channels), dtype=jnp.float32)

    # Deterministic parameter init per _weights_init: BN gamma=1, beta=0.
    gammas = jnp.ones((k, in_channels), dtype=jnp.float32)
    betas = jnp.zeros((k, in_channels), dtype=jnp.float32)
    merge_gamma = jnp.ones((1, in_channels), dtype=jnp.float32)
    merge_beta = jnp.zeros((1, in_channels), dtype=jnp.float32)

    outputs = multi_bn_neck(x, gammas, betas, merge_gamma, merge_beta,
                            loss_names)
    jax.block_until_ready(outputs)

    # Sanity check against a pure-JAX reference (training-mode BatchNorm1d).
    def bn(v, g, b):
        m = jnp.mean(v, axis=0, keepdims=True)
        s = jnp.mean((v - m) ** 2, axis=0, keepdims=True)
        return (v - m) / jnp.sqrt(s + EPS) * g + b

    ys = [bn(x, gammas[i], betas[i]) for i in range(k)]
    ref_first = sum(ys)                          # in-place aliasing bug
    ref_merged = bn(ref_first / float(k), merge_gamma[0], merge_beta[0])
    assert jnp.allclose(outputs[loss_names[0]], ref_first, atol=1e-4)
    assert jnp.allclose(outputs[loss_names[1]], ys[1], atol=1e-4)
    assert jnp.allclose(outputs[loss_names[2]], ys[2], atol=1e-4)
    assert jnp.allclose(outputs["merged"], ref_merged, atol=1e-4)

    print("KERNEL_OK")
</pallas_src>

<mosaic_0001>
module attributes {stable_mosaic.version = 11 : i64} {
  func.func @_multibnneck_kernel(%arg0: i32, %arg1: memref<8x128xf32, #tpu.memory_space<vmem>>, %arg2: memref<3x128xf32, #tpu.memory_space<vmem>>, %arg3: memref<3x128xf32, #tpu.memory_space<vmem>>, %arg4: memref<1x128xf32, #tpu.memory_space<vmem>>, %arg5: memref<1x128xf32, #tpu.memory_space<vmem>>, %arg6: memref<2x8x128xf32, #tpu.memory_space<vmem>>, %arg7: memref<8x128xf32, #tpu.memory_space<vmem>>, %arg8: memref<8x128xf32, #tpu.memory_space<vmem>>) attributes {dimension_semantics = [#tpu.dimension_semantics<parallel>], iteration_bounds = array<i64: 1>, scalar_prefetch = 0 : i64, scratch_operands = 0 : i64, tpu.core_type = #tpu.core_type<tc>, window_params = [{transform_indices = @transform_0, window_bounds = array<i64: 8, 128>}, {transform_indices = @transform_1, window_bounds = array<i64: 3, 128>}, {transform_indices = @transform_2, window_bounds = array<i64: 3, 128>}, {transform_indices = @transform_3, window_bounds = array<i64: 1, 128>}, {transform_indices = @transform_4, window_bounds = array<i64: 1, 128>}, {transform_indices = @transform_5, window_bounds = array<i64: 2, 8, 128>}, {transform_indices = @transform_6, window_bounds = array<i64: 8, 128>}, {transform_indices = @transform_7, window_bounds = array<i64: 8, 128>}]} {
    %c0 = arith.constant 0 : index
    %c0_0 = arith.constant 0 : index
    %0 = vector.load %arg1[%c0, %c0_0] : memref<8x128xf32, #tpu.memory_space<vmem>>, vector<8x128xf32>
    %cst = arith.constant dense<0.000000e+00> : vector<128xf32>
    %1 = vector.multi_reduction <add>, %0, %cst [0] : vector<8x128xf32> to vector<128xf32>
    %2 = vector.shape_cast %1 : vector<128xf32> to vector<1x128xf32>
    %cst_1 = arith.constant 1.250000e-01 : f32
    %3 = vector.broadcast %cst_1 : f32 to vector<1x128xf32>
    %4 = arith.mulf %2, %3 : vector<1x128xf32>
    %5 = vector.broadcast %4 : vector<1x128xf32> to vector<8x128xf32>
    %6 = arith.subf %0, %5 : vector<8x128xf32>
    %7 = arith.mulf %6, %6 : vector<8x128xf32>
    %cst_2 = arith.constant dense<0.000000e+00> : vector<128xf32>
    %8 = vector.multi_reduction <add>, %7, %cst_2 [0] : vector<8x128xf32> to vector<128xf32>
    %9 = vector.shape_cast %8 : vector<128xf32> to vector<1x128xf32>
    %cst_3 = arith.constant 1.250000e-01 : f32
    %10 = vector.broadcast %cst_3 : f32 to vector<1x128xf32>
    %11 = arith.mulf %9, %10 : vector<1x128xf32>
    %cst_4 = arith.constant 9.99999974E-6 : f32
    %12 = vector.broadcast %cst_4 : f32 to vector<1x128xf32>
    %13 = arith.addf %11, %12 : vector<1x128xf32>
    %14 = math.rsqrt %13 : vector<1x128xf32>
    %15 = vector.broadcast %14 : vector<1x128xf32> to vector<8x128xf32>
    %16 = arith.mulf %6, %15 : vector<8x128xf32>
    %c0_5 = arith.constant 0 : index
    %c0_6 = arith.constant 0 : index
    %17 = vector.load %arg2[%c0_5, %c0_6] : memref<3x128xf32, #tpu.memory_space<vmem>>, vector<3x128xf32>
    %c0_7 = arith.constant 0 : index
    %c0_8 = arith.constant 0 : index
    %18 = vector.load %arg3[%c0_7, %c0_8] : memref<3x128xf32, #tpu.memory_space<vmem>>, vector<3x128xf32>
    %19 = vector.extract_strided_slice %17 {offsets = [1, 0], sizes = [1, 128], strides = [1, 1]} : vector<3x128xf32> to vector<1x128xf32>
    %20 = vector.broadcast %19 : vector<1x128xf32> to vector<8x128xf32>
    %21 = arith.mulf %16, %20 : vector<8x128xf32>
    %22 = vector.extract_strided_slice %18 {offsets = [1, 0], sizes = [1, 128], strides = [1, 1]} : vector<3x128xf32> to vector<1x128xf32>
    %23 = vector.broadcast %22 : vector<1x128xf32> to vector<8x128xf32>
    %24 = arith.addf %21, %23 : vector<8x128xf32>
    %c0_9 = arith.constant 0 : index
    %c0_10 = arith.constant 0 : index
    %c0_11 = arith.constant 0 : index
    %25 = vector.load %arg6[%c0_9, %c0_10, %c0_11] : memref<2x8x128xf32, #tpu.memory_space<vmem>>, vector<1x8x128xf32>
    %26 = vector.shape_cast %25 : vector<1x8x128xf32> to vector<8x128xf32>
    %27 = vector.shape_cast %24 : vector<8x128xf32> to vector<1x8x128xf32>
    tpu.vector_store %arg6[%c0_9, %c0_10, %c0_11], %27 {strides = array<i32>} : memref<2x8x128xf32, #tpu.memory_space<vmem>>, vector<1x8x128xf32>,
    %28 = vector.extract_strided_slice %17 {offsets = [2, 0], sizes = [1, 128], strides = [1, 1]} : vector<3x128xf32> to vector<1x128xf32>
    %29 = vector.broadcast %28 : vector<1x128xf32> to vector<8x128xf32>
    %30 = arith.mulf %16, %29 : vector<8x128xf32>
    %31 = vector.extract_strided_slice %18 {offsets = [2, 0], sizes = [1, 128], strides = [1, 1]} : vector<3x128xf32> to vector<1x128xf32>
    %32 = vector.broadcast %31 : vector<1x128xf32> to vector<8x128xf32>
    %33 = arith.addf %30, %32 : vector<8x128xf32>
    %c1 = arith.constant 1 : index
    %c0_12 = arith.constant 0 : index
    %c0_13 = arith.constant 0 : index
    %34 = vector.load %arg6[%c1, %c0_12, %c0_13] : memref<2x8x128xf32, #tpu.memory_space<vmem>>, vector<1x8x128xf32>
    %35 = vector.shape_cast %34 : vector<1x8x128xf32> to vector<8x128xf32>
    %36 = vector.shape_cast %33 : vector<8x128xf32> to vector<1x8x128xf32>
    tpu.vector_store %arg6[%c1, %c0_12, %c0_13], %36 {strides = array<i32>} : memref<2x8x128xf32, #tpu.memory_space<vmem>>, vector<1x8x128xf32>,
    %cst_14 = arith.constant dense<0.000000e+00> : vector<128xf32>
    %37 = vector.multi_reduction <add>, %17, %cst_14 [0] : vector<3x128xf32> to vector<128xf32>
    %38 = vector.shape_cast %37 : vector<128xf32> to vector<1x128xf32>
    %cst_15 = arith.constant dense<0.000000e+00> : vector<128xf32>
    %39 = vector.multi_reduction <add>, %18, %cst_15 [0] : vector<3x128xf32> to vector<128xf32>
    %40 = vector.shape_cast %39 : vector<128xf32> to vector<1x128xf32>
    %41 = vector.broadcast %38 : vector<1x128xf32> to vector<8x128xf32>
    %42 = arith.mulf %16, %41 : vector<8x128xf32>
    %43 = vector.broadcast %40 : vector<1x128xf32> to vector<8x128xf32>
    %44 = arith.addf %42, %43 : vector<8x128xf32>
    %c0_16 = arith.constant 0 : index
    %c0_17 = arith.constant 0 : index
    %45 = vector.load %arg7[%c0_16, %c0_17] : memref<8x128xf32, #tpu.memory_space<vmem>>, vector<8x128xf32>
    tpu.vector_store %arg7[%c0_16, %c0_17], %44 {strides = array<i32>} : memref<8x128xf32, #tpu.memory_space<vmem>>, vector<8x128xf32>,
    %cst_18 = arith.constant 0.333333343 : f32
    %46 = vector.broadcast %cst_18 : f32 to vector<8x128xf32>
    %47 = arith.mulf %44, %46 : vector<8x128xf32>
    %cst_19 = arith.constant dense<0.000000e+00> : vector<128xf32>
    %48 = vector.multi_reduction <add>, %47, %cst_19 [0] : vector<8x128xf32> to vector<128xf32>
    %49 = vector.shape_cast %48 : vector<128xf32> to vector<1x128xf32>
    %cst_20 = arith.constant 1.250000e-01 : f32
    %50 = vector.broadcast %cst_20 : f32 to vector<1x128xf32>
    %51 = arith.mulf %49, %50 : vector<1x128xf32>
    %52 = vector.broadcast %51 : vector<1x128xf32> to vector<8x128xf32>
    %53 = arith.subf %47, %52 : vector<8x128xf32>
    %54 = arith.mulf %53, %53 : vector<8x128xf32>
    %cst_21 = arith.constant dense<0.000000e+00> : vector<128xf32>
    %55 = vector.multi_reduction <add>, %54, %cst_21 [0] : vector<8x128xf32> to vector<128xf32>
    %56 = vector.shape_cast %55 : vector<128xf32> to vector<1x128xf32>
    %cst_22 = arith.constant 1.250000e-01 : f32
    %57 = vector.broadcast %cst_22 : f32 to vector<1x128xf32>
    %58 = arith.mulf %56, %57 : vector<1x128xf32>
    %cst_23 = arith.constant 9.99999974E-6 : f32
    %59 = vector.broadcast %cst_23 : f32 to vector<1x128xf32>
    %60 = arith.addf %58, %59 : vector<1x128xf32>
    %61 = math.rsqrt %60 : vector<1x128xf32>
    %62 = vector.broadcast %61 : vector<1x128xf32> to vector<8x128xf32>
    %63 = arith.mulf %53, %62 : vector<8x128xf32>
    %c0_24 = arith.constant 0 : index
    %c0_25 = arith.constant 0 : index
    %64 = vector.load %arg4[%c0_24, %c0_25] : memref<1x128xf32, #tpu.memory_space<vmem>>, vector<1x128xf32>
    %65 = vector.broadcast %64 : vector<1x128xf32> to vector<8x128xf32>
    %66 = arith.mulf %63, %65 : vector<8x128xf32>
    %c0_26 = arith.constant 0 : index
    %c0_27 = arith.constant 0 : index
    %67 = vector.load %arg5[%c0_26, %c0_27] : memref<1x128xf32, #tpu.memory_space<vmem>>, vector<1x128xf32>
    %68 = vector.broadcast %67 : vector<1x128xf32> to vector<8x128xf32>
    %69 = arith.addf %66, %68 : vector<8x128xf32>
    %c0_28 = arith.constant 0 : index
    %c0_29 = arith.constant 0 : index
    %70 = vector.load %arg8[%c0_28, %c0_29] : memref<8x128xf32, #tpu.memory_space<vmem>>, vector<8x128xf32>
    tpu.vector_store %arg8[%c0_28, %c0_29], %69 {strides = array<i32>} : memref<8x128xf32, #tpu.memory_space<vmem>>, vector<8x128xf32>,
    return
  }
  func.func @transform_0(%arg0: i32) -> (i32, i32) {
    %c0_i32 = arith.constant 0 : i32
    %c0_i32_0 = arith.constant 0 : i32
    return %c0_i32, %arg0 : i32, i32
  }
  func.func @transform_1(%arg0: i32) -> (i32, i32) {
    %c0_i32 = arith.constant 0 : i32
    %c0_i32_0 = arith.constant 0 : i32
    return %c0_i32, %arg0 : i32, i32
  }
  func.func @transform_2(%arg0: i32) -> (i32, i32) {
    %c0_i32 = arith.constant 0 : i32
    %c0_i32_0 = arith.constant 0 : i32
    return %c0_i32, %arg0 : i32, i32
  }
  func.func @transform_3(%arg0: i32) -> (i32, i32) {
    %c0_i32 = arith.constant 0 : i32
    %c0_i32_0 = arith.constant 0 : i32
    return %c0_i32, %arg0 : i32, i32
  }
  func.func @transform_4(%arg0: i32) -> (i32, i32) {
    %c0_i32 = arith.constant 0 : i32
    %c0_i32_0 = arith.constant 0 : i32
    return %c0_i32, %arg0 : i32, i32
  }
  func.func @transform_5(%arg0: i32) -> (i32, i32, i32) {
    %c0_i32 = arith.constant 0 : i32
    %c0_i32_0 = arith.constant 0 : i32
    %c0_i32_1 = arith.constant 0 : i32
    return %c0_i32, %c0_i32_0, %arg0 : i32, i32, i32
  }
  func.func @transform_6(%arg0: i32) -> (i32, i32) {
    %c0_i32 = arith.constant 0 : i32
    %c0_i32_0 = arith.constant 0 : i32
    return %c0_i32, %arg0 : i32, i32
  }
  func.func @transform_7(%arg0: i32) -> (i32, i32) {
    %c0_i32 = arith.constant 0 : i32
    %c0_i32_0 = arith.constant 0 : i32
    return %c0_i32, %arg0 : i32, i32
  }
}

</mosaic_0001>

<bundles_post_ra>
// kernel: tpu_custom_call.1
= control target key start
LH: loop header
LB: loop body
LE: loop exit
PB: predicated region body
PF: predicated region fallthrough
CT: control target
= control target key end

     0   :  { %13 = vsyncpa [#allocation3], 0  ;;  %s448_s0 = inlined_call_operand.hbm [shape: f32[8,128], index: 0, kind: input, shape index: {}]   ;;  %s449_s1 = inlined_call_operand.hbm [shape: f32[3,128], index: 1, kind: input, shape index: {}]   ;;  %s450_s2 = inlined_call_operand.vmem [shape: f32[3,128], index: 2, kind: input, shape index: {}]   ;;  %s451_s3 = inlined_call_operand.vmem [shape: f32[1,128], index: 3, kind: input, shape index: {}]   ;;  %s452_s4 = inlined_call_operand.vmem [shape: f32[1,128], index: 4, kind: input, shape index: {}]   ;;  %s453_s5 = inlined_call_operand.hbm [shape: f32[2,8,128], index: 5, kind: output, shape index: {0}]   ;;  %s454_s6 = inlined_call_operand.hbm [shape: f32[8,128], index: 6, kind: output, shape index: {1}]   ;;  %s455_s7 = inlined_call_operand.hbm [shape: f32[8,128], index: 7, kind: output, shape index: {2}]  }
   0x1   :  { %14 = vsyncpa [#allocation6], 0 }
   0x2   :  { %15 = vsyncpa [#allocation4], 0 }
   0x3   :  { %16 = vsyncpa [#allocation9], 0  ;;  %s325_s24 = smov [#allocation2]   ;;  %s326_s26 = smov [#allocation5]  }
   0x4   :  { %s23_s25 = sshll.u32 %s325_s24, 4  ;;  %s33_s27 = sshll.u32 %s326_s26, 4  ;;  %s24_s25 = int_to_ptr.vmem [resolvable:$true] %s23_s25  ;;  %s34_s27 = int_to_ptr.vmem [resolvable:$true] %s33_s27 }
   0x5   :  { %s207_s30 = scalar_lea.hbm %s448_s0, 128 }
   0x6   :  { %p208_p0 = scmp.ne.s32.totalorder %s448_s0, %s207_s30  ;;  %p211_p1 = scmp.lt.u32.totalorder %s207_s30, %s448_s0 }
   0x8   :  { %p213_p2 = pnand %p211_p1, %p208_p0 }
   0xa   :  { %216 = shalt.err (!%p213_p2)
}
   0xb   :  { %s217_s12 = scalar_lea.vmem %s24_s25, 128  ;;  %p222_p4 = scmp.lt.s32.totalorder %s24_s25, %s24_s25 }
   0xc   :  { %p218_p3 = scmp.ne.s32.totalorder %s24_s25, %s217_s12  ;;  %p223_p5 = scmp.lt.s32.totalorder %s217_s12, %s217_s12 }
   0xe   :  { %p224_p6 = por %p223_p5, %p222_p4 }
  0x10   :  { %p225_p7 = pnand %p224_p6, %p218_p3 }
  0x12   :  { %228 = shalt.err (!%p225_p7)
}
  0x13   :  { %26 = dma.hbm_to_vmem [thread:$0]  %s448_s0, 128, %s24_s25, [#allocation3]  }
  0x14   :  { %s229_s17 = scalar_lea.hbm %s449_s1, 64 }
  0x15   :  { %p230_p8 = scmp.ne.s32.totalorder %s449_s1, %s229_s17  ;;  %p233_p9 = scmp.lt.u32.totalorder %s229_s17, %s449_s1 }
  0x17   :  { %p235_p10 = pnand %p233_p9, %p230_p8 }
  0x19   :  { %238 = shalt.err (!%p235_p10)
}
  0x1a   :  { %s239_s22 = scalar_lea.vmem %s34_s27, 64  ;;  %p244_p12 = scmp.lt.s32.totalorder %s34_s27, %s34_s27 }
  0x1b   :  { %p240_p11 = scmp.ne.s32.totalorder %s34_s27, %s239_s22  ;;  %p245_p13 = scmp.lt.s32.totalorder %s239_s22, %s239_s22 }
  0x1d   :  { %p246_p0 = por %p245_p13, %p244_p12 }
  0x1f   :  { %p247_p1 = pnand %p246_p0, %p240_p11 }
  0x21   :  { %250 = shalt.err (!%p247_p1)
}
  0x22   :  { %36 = dma.hbm_to_vmem [thread:$0]  %s449_s1, 64, %s34_s27, [#allocation6]  }
  0x23   :  { %317 = dma.done.wait [#allocation3], 128  }
  0x24   :  { %318 = vsyncadd [#allocation3], 4294967168 }
  0x25   :  { %319 = dma.done.wait [#allocation6], 64  }
  0x26   :  { %320 = vsyncadd [#allocation6], 4294967232  ;;  %v49_v0 = vld [vmem:[#allocation2] sm:$0xff]  ;;  %v69_v10 = vld [vmem:[#allocation5] sm:$0x7]  ;;  %vm94_vm0 = vcmask 1042432   ;;  %v71_v26 = vlaneseq }
  0x27   :  { %v50_v1 = vrot.slane %v49_v0, 4  ;;  %v70_v12 = vld [vmem:[%s450_s2] sm:$0x7]  ;;  %v95_v14 = vsel %vm94_vm0, %v69_v10, 0.0  ;;  %s327_s1 = smov [#allocation8]   ;;  %s328_s26 = smov [#allocation7]  }
  0x28   :  { %v102_v16 = vsel %vm94_vm0, %v70_v12, 0.0  ;;  %v96_v17 = vrot.slane %v95_v14, 4  ;;  %v72_v30 = vshrl.u32 %v71_v26, 7  ;;  %s167_s2 = sshll.u32 %s327_s1, 4  ;;  %s154_s27 = sshll.u32 %s328_s26, 4  ;;  %s168_s2 = int_to_ptr.vmem [resolvable:$true] %s167_s2  ;;  %s399_s27 = int_to_ptr.vmem [resolvable:$true] %s154_s27 }
  0x29   :  { %v51_v2 = vadd.f32 %v50_v1, %v49_v0  ;;  %v103_v19 = vrot.slane %v102_v16, 4  ;;  %s251_s28 = scalar_lea.vmem %s168_s2, 128  ;;  %p256_p3 = scmp.lt.s32.totalorder %s168_s2, %s168_s2 }
  0x2a   :  { %v97_v21 = vadd.f32 %v96_v17, %v95_v14  ;;  %v73_v33 = vsub.s32 1, %v72_v30  ;;  %v84_v34 = vsub.s32 2, %v72_v30  ;;  %p252_p2 = scmp.ne.s32.totalorder %s168_s2, %s251_s28  ;;  %p257_p4 = scmp.lt.s32.totalorder %s251_s28, %s251_s28 }
  0x2b   :  { %v52_v3 = vrot.slane %v51_v2, 2  ;;  %v104_v23 = vadd.f32 %v103_v19, %v102_v16 }
  0x2c   :  { %v98_v25 = vrot.slane %v97_v21, 2  ;;  %v74_v37 = vrot.slane %v69_v10, %v73_v33  ;;  %v85_v38 = vrot.slane %v69_v10, %v84_v34  ;;  %v79_v42 = vrot.slane %v70_v12, %v73_v33  ;;  %p258_p5 = por %p257_p4, %p256_p3 }
  0x2d   :  { %v53_v4 = vadd.f32 %v52_v3, %v51_v2  ;;  %v105_v28 = vrot.slane %v104_v23, 2  ;;  %v90_v43 = vrot.slane %v70_v12, %v84_v34 }
  0x2e   :  { %v99_v29 = vadd.f32 %v98_v25, %v97_v21  ;;  %p259_p6 = pnand %p258_p5, %p252_p2 }
  0x2f   :  { %v54_v5 = vrot.slane %v53_v4, 1  ;;  %v106_v31 = vadd.f32 %v105_v28, %v104_v23 }
  0x30   :  { %v100_v32 = vrot.slane %v99_v29, 1 }
  0x31   :  { %v55_v6 = vadd.f32 %v54_v5, %v53_v4  ;;  %v107_v35 = vrot.slane %v106_v31, 1 }
  0x32   :  { %v101_v36 = vadd.f32 %v100_v32, %v99_v29 }
  0x33   :  { %v56_v7 = vmul.f32 0.125, %v55_v6  ;;  %v108_v41 = vadd.f32 %v107_v35, %v106_v31 }
  0x35   :  { %v57_v8 = vsub.f32 %v49_v0, %v56_v7 }
  0x37   :  { %v58_v9 = vmul.f32 %v57_v8, %v57_v8 }
  0x39   :  { %v59_v11 = vrot.slane %v58_v9, 4 }
  0x3b   :  { %v60_v13 = vadd.f32 %v59_v11, %v58_v9 }
  0x3d   :  { %v61_v15 = vrot.slane %v60_v13, 2 }
  0x3f   :  { %v62_v18 = vadd.f32 %v61_v15, %v60_v13 }
  0x41   :  { %v63_v20 = vrot.slane %v62_v18, 1 }
  0x43   :  { %v64_v22 = vadd.f32 %v63_v20, %v62_v18 }
  0x45   :  { %v65_v24 = vmul.f32 0.125, %v64_v22 }
  0x47   :  { %v66_v27 = vadd.f32 1e-05, %v65_v24 }
  0x49   :  { %203 = vrsqrt.f32 %v66_v27 }
  0x53   :  { %v204_v39 = vpop.eup %203 }
  0x54   :  { %v68_v40 = vmul.f32 %v204_v39, %v57_v8 }
  0x56   :  { %v109_v44 = vmul.f32 %v101_v36, %v68_v40  ;;  %v75_v45 = vmul.f32 %v74_v37, %v68_v40  ;;  %v86_v46 = vmul.f32 %v85_v38, %v68_v40 }
  0x58   :  { %v110_v47 = vadd.f32 %v109_v44, %v108_v41  ;;  %v80_v48 = vadd.f32 %v79_v42, %v75_v45  ;;  %v91_v49 = vadd.f32 %v90_v43, %v86_v46 }
  0x5a   :  { %111 = vst [vmem:[#allocation8] sm:$0xff] %v110_v47  ;;  %v112_v50 = vmul.f32 0.33333334, %v110_v47  ;;  %81 = vst [vmem:[#allocation7] sm:$0xff] %v80_v48 }
  0x5b   :  { %93 = vst [vmem:[#allocation7 + $0x8] sm:$0xff] %v91_v49 }
  0x5c   :  { %262 = shalt.err (!%p259_p6)
}
  0x5d   :  { %s263_s8 = scalar_lea.hbm %s454_s6, 128 }
  0x5e   :  { %p264_p7 = scmp.ne.s32.totalorder %s454_s6, %s263_s8  ;;  %p267_p8 = scmp.lt.u32.totalorder %s263_s8, %s454_s6 }
  0x60   :  { %p269_p9 = pnand %p267_p8, %p264_p7 }
  0x62   :  { %272 = shalt.err (!%p269_p9)
}
  0x63   :  { %170 = dma.vmem_to_hbm [thread:$0]  %s168_s2, 128, %s454_s6, [#allocation9]   ;;  %v113_v51 = vrot.slane %v112_v50, 4 }
  0x64   :  { %s273_s15 = scalar_lea.vmem %s399_s27, 256  ;;  %p278_p11 = scmp.lt.s32.totalorder %s399_s27, %s399_s27 }
  0x65   :  { %p274_p10 = scmp.ne.s32.totalorder %s399_s27, %s273_s15  ;;  %p279_p12 = scmp.lt.s32.totalorder %s273_s15, %s273_s15 }
  0x67   :  { %p280_p13 = por %p279_p12, %p278_p11 }
  0x69   :  { %p281_p0 = pnand %p280_p13, %p274_p10 }
  0x6b   :  { %284 = shalt.err (!%p281_p0)
}
  0x6c   :  { %s285_s18 = scalar_lea.hbm %s453_s5, 256 }
  0x6d   :  { %p286_p1 = scmp.ne.s32.totalorder %s453_s5, %s285_s18  ;;  %p289_p2 = scmp.lt.u32.totalorder %s285_s18, %s453_s5 }
  0x6f   :  { %p291_p3 = pnand %p289_p2, %p286_p1 }
  0x71   :  { %294 = shalt.err (!%p291_p3)
}
  0x72   :  { %s329_s6 = smov 128   ;;  %s330_s0 = smov 8   ;;  %v114_v52 = vadd.f32 %v113_v51, %v112_v50  ;;  %v194_v5 = vld [vmem:[%s451_s3] ss:$0 sm:$0xff] }
  0x73   :  { %160 = dma.vmem_to_hbm [thread:$0]  %s399_s27, 256, %s453_s5, [#allocation4], %s329_s6, %s329_s6, %s330_s0  }
  0x74   :  { %v115_v53 = vrot.slane %v114_v52, 2  ;;  %v195_v7 = vld [vmem:[%s452_s4] ss:$0 sm:$0xff]  ;;  %s331_s26 = smov [#allocation10]  }
  0x75   :  { %s177_s27 = sshll.u32 %s331_s26, 4  ;;  %s178_s27 = int_to_ptr.vmem [resolvable:$true] %s177_s27 }
  0x76   :  { %v116_v54 = vadd.f32 %v115_v53, %v114_v52  ;;  %s295_s28 = scalar_lea.vmem %s178_s27, 128  ;;  %p300_p5 = scmp.lt.s32.totalorder %s178_s27, %s178_s27 }
  0x77   :  { %p296_p4 = scmp.ne.s32.totalorder %s178_s27, %s295_s28  ;;  %p301_p6 = scmp.lt.s32.totalorder %s295_s28, %s295_s28 }
  0x78   :  { %v117_v55 = vrot.slane %v116_v54, 1 }
  0x79   :  { %p302_p7 = por %p301_p6, %p300_p5 }
  0x7a   :  { %v118_v56 = vadd.f32 %v117_v55, %v116_v54 }
  0x7b   :  { %p303_p8 = pnand %p302_p7, %p296_p4 }
  0x7c   :  { %v119_v57 = vmul.f32 0.125, %v118_v56 }
  0x7e   :  { %v120_v58 = vsub.f32 %v112_v50, %v119_v57 }
  0x80   :  { %v121_v59 = vmul.f32 %v120_v58, %v120_v58 }
  0x82   :  { %v122_v60 = vrot.slane %v121_v59, 4 }
  0x84   :  { %v123_v61 = vadd.f32 %v122_v60, %v121_v59 }
  0x86   :  { %v124_v62 = vrot.slane %v123_v61, 2 }
  0x88   :  { %v125_v63 = vadd.f32 %v124_v62, %v123_v61 }
  0x8a   :  { %v126_v0 = vrot.slane %v125_v63, 1 }
  0x8c   :  { %v127_v1 = vadd.f32 %v126_v0, %v125_v63 }
  0x8e   :  { %v128_v2 = vmul.f32 0.125, %v127_v1 }
  0x90   :  { %v129_v3 = vadd.f32 1e-05, %v128_v2 }
  0x92   :  { %205 = vrsqrt.f32 %v129_v3 }
  0x9c   :  { %v206_v4 = vpop.eup %205 }
  0x9d   :  { %v131_v6 = vmul.f32 %v206_v4, %v120_v58 }
  0x9f   :  { %v139_v8 = vmul.f32 %v194_v5, %v131_v6 }
  0xa1   :  { %v147_v9 = vadd.f32 %v195_v7, %v139_v8 }
  0xa3   :  { %148 = vst [vmem:[#allocation10] sm:$0xff] %v147_v9 }
  0xa4   :  { %306 = shalt.err (!%p303_p8)
}
  0xa5   :  { %s307_s30 = scalar_lea.hbm %s455_s7, 128 }
  0xa6   :  { %p308_p9 = scmp.ne.s32.totalorder %s455_s7, %s307_s30  ;;  %p311_p10 = scmp.lt.u32.totalorder %s307_s30, %s455_s7 }
  0xa8   :  { %p313_p11 = pnand %p311_p10, %p308_p9 }
  0xaa   :  { %316 = shalt.err (!%p313_p11)
}
  0xab   :  { %180 = dma.vmem_to_hbm [thread:$0]  %s178_s27, 128, %s455_s7, [#allocation9]  }
  0xac   :  { %321 = dma.done.wait [#allocation4], 256  }
  0xad   :  { %322 = vsyncadd [#allocation4], 4294967040 }
  0xae   :  { %323 = dma.done.wait [#allocation9], 256  }
  0xaf   :  { %324 = vsyncadd [#allocation9], 4294967040 }
  0xb0   :  { %190 = vsyncpa [#allocation3], 1 }
  0xb1   :  { %191 = vsyncpa [#allocation6], 1 }
  0xb2   :  { %192 = vsyncpa [#allocation4], 1 }
  0xb3   :  { %193 = vsyncpa [#allocation9], 1 }

</bundles_post_ra>
